<compile_context>
chip_gen: v5e
topology: v5e:2x2
jax: 0.10.0
libtpu: 0.0.40
codegen_flags: <defaults>
</compile_context>

<pallas_src>
import numpy as np
import jax
import jax.numpy as jnp
from jax.experimental import pallas as pl
from jax.experimental.pallas import tpu as pltpu


# ----------------------------- Pallas kernel --------------------------------

def _ff_mlp_kernel(x_ref, w1t_ref, b1_ref, w2t_ref, b2_ref, o_ref):
    # x_ref:  (tm, D)   one block of flattened (batch*agents) rows
    # w1t_ref:(D, F)    fc1 weight, already transposed (W1.T)
    # b1_ref: (1, F)
    # w2t_ref:(F, D)    fc2 weight, already transposed (W2.T)
    # b2_ref: (1, D)
    x = x_ref[...]

    # fc1 + ReLU
    h = jnp.dot(x, w1t_ref[...], preferred_element_type=jnp.float32) + b1_ref[...]
    h = jnp.maximum(h, 0.0)

    # fc2
    y = jnp.dot(h, w2t_ref[...], preferred_element_type=jnp.float32) + b2_ref[...]

    o_ref[...] = y.astype(o_ref.dtype)


# ------------------------------ Wrapper --------------------------------------

def ff_mlp_forward(x, params, *, num_blocks=None):
    """params = (W1, b1, W2, b2) in nn.Linear layout:
       W1: (dim_ff, model_dim), b1: (dim_ff,), W2: (model_dim, dim_ff), b2: (model_dim,)."""
    W1, b1, W2, b2 = params
    *lead, D = x.shape
    F = W1.shape[0]
    assert W1.shape == (F, D) and W2.shape == (D, F)
    N = int(np.prod(lead))

    x2 = x.reshape(N, D)

    # Keep >=2 parallel grid steps when the row count allows it (v7x has 2 TCs);
    # otherwise fall back to a single fused block (best on v5e/v6e anyway).
    if num_blocks is None:
        num_blocks = 2 if (N % 2 == 0 and (N // 2) % 8 == 0) else 1
    assert N % num_blocks == 0
    tm = N // num_blocks
    assert tm == N or tm % 8 == 0, "row block must be a multiple of 8 sublanes"

    x_spec = pl.BlockSpec((tm, D), lambda i: (i, 0))
    w1_spec = pl.BlockSpec((D, F), lambda i: (0, 0))   # resident across steps
    b1_spec = pl.BlockSpec((1, F), lambda i: (0, 0))
    w2_spec = pl.BlockSpec((F, D), lambda i: (0, 0))
    b2_spec = pl.BlockSpec((1, D), lambda i: (0, 0))
    out_spec = pl.BlockSpec((tm, D), lambda i: (i, 0))

    out = pl.pallas_call(
        _ff_mlp_kernel,
        out_shape=jax.ShapeDtypeStruct((N, D), x.dtype),
        grid=(num_blocks,),
        in_specs=[x_spec, w1_spec, b1_spec, w2_spec, b2_spec],
        out_specs=out_spec,
        compiler_params=pltpu.CompilerParams(dimension_semantics=("parallel",)),
    )(x2, W1.T, b1.reshape(1, F), W2.T, b2.reshape(1, D))

    return out.reshape(*lead, D)


# ------------------------- Deterministic parameter init ----------------------

def orthogonal_(key, shape, gain=1.0):
    """Mimics nn.init.orthogonal_ for a 2-D weight (rows, cols), deterministically."""
    rows, cols = shape
    a = jax.random.normal(key, (rows, cols) if rows >= cols else (cols, rows),
                          dtype=jnp.float32)
    q, r = jnp.linalg.qr(a)
    q = q * jnp.sign(jnp.diagonal(r))[None, :]      # make decomposition unique
    if rows < cols:
        q = q.T
    return (gain * q).astype(jnp.float32)


def make_params(key, model_dim, dim_ff):
    k1, k2 = jax.random.split(key)
    gain = float(np.sqrt(2.0))                      # nn.init.calculate_gain('relu')
    W1 = orthogonal_(k1, (dim_ff, model_dim), gain)
    W2 = orthogonal_(k2, (model_dim, dim_ff), gain)
    b1 = jnp.zeros((dim_ff,), jnp.float32)
    b2 = jnp.zeros((model_dim,), jnp.float32)
    return (W1, b1, W2, b2)


# ------------------------------ Pure-JAX reference ----------------------------

def ff_mlp_reference(x, params):
    W1, b1, W2, b2 = params
    h = jax.nn.relu(x @ W1.T + b1)
    return h @ W2.T + b2


# ----------------------------------- Main -------------------------------------

if __name__ == "__main__":
    bs, n_agents, model_dim, dim_ff = 2, 8, 32, 128

    key = jax.random.PRNGKey(0)
    kx, kp = jax.random.split(key)
    x = jax.random.normal(kx, (bs, n_agents, model_dim), dtype=jnp.float32)
    params = make_params(kp, model_dim, dim_ff)

    out = ff_mlp_forward(x, params)
    out = jax.block_until_ready(out)

    ref = ff_mlp_reference(x, params)
    assert out.shape == (bs, n_agents, model_dim)
    np.testing.assert_allclose(np.asarray(out), np.asarray(ref), rtol=1e-5, atol=1e-5)

    print("KERNEL_OK")
</pallas_src>

<mosaic_0001>
module attributes {stable_mosaic.version = 11 : i64} {
  func.func @_ff_mlp_kernel(%arg0: i32, %arg1: memref<8x32xf32, #tpu.memory_space<vmem>>, %arg2: memref<32x128xf32, #tpu.memory_space<vmem>>, %arg3: memref<1x128xf32, #tpu.memory_space<vmem>>, %arg4: memref<128x32xf32, #tpu.memory_space<vmem>>, %arg5: memref<1x32xf32, #tpu.memory_space<vmem>>, %arg6: memref<8x32xf32, #tpu.memory_space<vmem>>) attributes {dimension_semantics = [#tpu.dimension_semantics<parallel>], iteration_bounds = array<i64: 2>, scalar_prefetch = 0 : i64, scratch_operands = 0 : i64, tpu.core_type = #tpu.core_type<tc>, window_params = [{transform_indices = @transform_0, window_bounds = array<i64: 8, 32>}, {pipeline_mode = #tpu.pipeline_mode<synchronous>, transform_indices = @transform_1, window_bounds = array<i64: 32, 128>}, {pipeline_mode = #tpu.pipeline_mode<synchronous>, transform_indices = @transform_2, window_bounds = array<i64: 1, 128>}, {pipeline_mode = #tpu.pipeline_mode<synchronous>, transform_indices = @transform_3, window_bounds = array<i64: 128, 32>}, {pipeline_mode = #tpu.pipeline_mode<synchronous>, transform_indices = @transform_4, window_bounds = array<i64: 1, 32>}, {transform_indices = @transform_5, window_bounds = array<i64: 8, 32>}]} {
    %c0 = arith.constant 0 : index
    %c0_0 = arith.constant 0 : index
    %0 = vector.load %arg1[%c0, %c0_0] : memref<8x32xf32, #tpu.memory_space<vmem>>, vector<8x32xf32>
    %c0_1 = arith.constant 0 : index
    %c0_2 = arith.constant 0 : index
    %1 = vector.load %arg2[%c0_1, %c0_2] : memref<32x128xf32, #tpu.memory_space<vmem>>, vector<32x128xf32>
    %cst = arith.constant dense<0.000000e+00> : vector<8x128xf32>
    %2 = tpu.matmul %0, %1, %cst {dimension_numbers = #tpu.dot_dimension_numbers<[1], [0], [0], [1], [0, 0, 1, 1], [], []>} : vector<8x32xf32>, vector<32x128xf32>, vector<8x128xf32> -> vector<8x128xf32>
    %c0_3 = arith.constant 0 : index
    %c0_4 = arith.constant 0 : index
    %3 = vector.load %arg3[%c0_3, %c0_4] : memref<1x128xf32, #tpu.memory_space<vmem>>, vector<1x128xf32>
    %4 = vector.broadcast %3 : vector<1x128xf32> to vector<8x128xf32>
    %5 = arith.addf %2, %4 : vector<8x128xf32>
    %cst_5 = arith.constant 0.000000e+00 : f32
    %6 = vector.broadcast %cst_5 : f32 to vector<8x128xf32>
    %7 = arith.maximumf %5, %6 : vector<8x128xf32>
    %c0_6 = arith.constant 0 : index
    %c0_7 = arith.constant 0 : index
    %8 = vector.load %arg4[%c0_6, %c0_7] : memref<128x32xf32, #tpu.memory_space<vmem>>, vector<128x32xf32>
    %cst_8 = arith.constant dense<0.000000e+00> : vector<8x32xf32>
    %9 = tpu.matmul %7, %8, %cst_8 {dimension_numbers = #tpu.dot_dimension_numbers<[1], [0], [0], [1], [0, 0, 1, 1], [], []>} : vector<8x128xf32>, vector<128x32xf32>, vector<8x32xf32> -> vector<8x32xf32>
    %c0_9 = arith.constant 0 : index
    %c0_10 = arith.constant 0 : index
    %10 = vector.load %arg5[%c0_9, %c0_10] : memref<1x32xf32, #tpu.memory_space<vmem>>, vector<1x32xf32>
    %11 = vector.broadcast %10 : vector<1x32xf32> to vector<8x32xf32>
    %12 = arith.addf %9, %11 : vector<8x32xf32>
    %c0_11 = arith.constant 0 : index
    %c0_12 = arith.constant 0 : index
    %13 = vector.load %arg6[%c0_11, %c0_12] : memref<8x32xf32, #tpu.memory_space<vmem>>, vector<8x32xf32>
    tpu.vector_store %arg6[%c0_11, %c0_12], %12 {strides = array<i32>} : memref<8x32xf32, #tpu.memory_space<vmem>>, vector<8x32xf32>,
    return
  }
  func.func @transform_0(%arg0: i32) -> (i32, i32) {
    %c0_i32 = arith.constant 0 : i32
    %c0_i32_0 = arith.constant 0 : i32
    return %arg0, %c0_i32 : i32, i32
  }
  func.func @transform_1(%arg0: i32) -> (i32, i32) {
    %c0_i32 = arith.constant 0 : i32
    %c0_i32_0 = arith.constant 0 : i32
    %c0_i32_1 = arith.constant 0 : i32
    return %c0_i32, %c0_i32_0 : i32, i32
  }
  func.func @transform_2(%arg0: i32) -> (i32, i32) {
    %c0_i32 = arith.constant 0 : i32
    %c0_i32_0 = arith.constant 0 : i32
    %c0_i32_1 = arith.constant 0 : i32
    return %c0_i32, %c0_i32_0 : i32, i32
  }
  func.func @transform_3(%arg0: i32) -> (i32, i32) {
    %c0_i32 = arith.constant 0 : i32
    %c0_i32_0 = arith.constant 0 : i32
    %c0_i32_1 = arith.constant 0 : i32
    return %c0_i32, %c0_i32_0 : i32, i32
  }
  func.func @transform_4(%arg0: i32) -> (i32, i32) {
    %c0_i32 = arith.constant 0 : i32
    %c0_i32_0 = arith.constant 0 : i32
    %c0_i32_1 = arith.constant 0 : i32
    return %c0_i32, %c0_i32_0 : i32, i32
  }
  func.func @transform_5(%arg0: i32) -> (i32, i32) {
    %c0_i32 = arith.constant 0 : i32
    %c0_i32_0 = arith.constant 0 : i32
    return %arg0, %c0_i32 : i32, i32
  }
}

</mosaic_0001>

<bundles_post_ra>
// kernel: tpu_custom_call.1
= control target key start
LH: loop header
LB: loop body
LE: loop exit
PB: predicated region body
PF: predicated region fallthrough
CT: control target
= control target key end

     0   :  { %10 = vsyncpa [#allocation3], 0  ;;  %s669_s0 = inlined_call_operand.vmem [shape: f32[16,32], index: 0, kind: input, shape index: {}]   ;;  %s670_s1 = inlined_call_operand.vmem [shape: f32[32,128], index: 1, kind: input, shape index: {}]   ;;  %s671_s2 = inlined_call_operand.vmem [shape: f32[1,128], index: 2, kind: input, shape index: {}]   ;;  %s672_s3 = inlined_call_operand.vmem [shape: f32[128,32], index: 3, kind: input, shape index: {}]   ;;  %s673_s4 = inlined_call_operand.vmem [shape: f32[1,32], index: 4, kind: input, shape index: {}]   ;;  %s674_s5 = inlined_call_operand.hbm [shape: f32[16,32], index: 5, kind: output, shape index: {}]  }
   0x1   :  { %12 = vsyncpa [#allocation3 + $0x1], 0  ;;  %s516_s18 = smov 0   ;;  %s518_s19 = smov 0  }
   0x2   :  { %s520_s20 = smov 0   ;;  %s522_s21 = smov 0  }
   0x3 LB: > { %s537_s22 = sadd.s32 4294967295, %s484_s21   ;;  %s370_s23 = sadd.s32 4294967294, %s484_s21   ;;  %s484_s21 = sphi %s522_s21, %s680_s21   ;;  %s480_s20 = sphi %s520_s20, %s679_s20   ;;  %s476_s19 = sphi %s518_s19, %s678_s19   ;;  %s472_s18 = sphi %s516_s18, %s677_s18  }
   0x4   : > { %s541_s24 = sadd.s32 1, %s484_s21   ;;  %s135_s25 = sadd.s32 1, %s480_s20 }
   0x5   : > { %s132_s26 = ssub.s32 %s484_s21, %s541_s24  ;;  %p145_p0 = scmp.ne.s32.totalorder %s480_s20, %s476_s19 }
   0x6   : > { %p133_p1 = scmp.eq.s32.totalorder %s132_s26, 0  ;;  %p146_p2 = scmp.eq.s32.totalorder %s537_s22, 1 }
   0x7   : > { %p151_p3 = scmp.ne.s32.totalorder %s476_s19, %s472_s18  ;;  %p152_p4 = scmp.eq.s32.totalorder %s370_s23, 1 }
   0x8   : > { %s552_s27 = scalar_select %p133_p1, %s480_s20, %s135_s25  }
   0x9   : > { %p554_p5 = por %p146_p2, %p145_p0  ;;  %p558_p6 = por %p152_p4, %p151_p3 }
   0xa   : > { %p373_p7 = scmp.ge.s32.totalorder %s484_s21, 1  ;;  %p189_p8 = scmp.lt.s32.totalorder %s484_s21, 3 }
   0xc   : > { %p190_p9 = pnand %p373_p7, %p189_p8 }
   0xd   : > { %p216_p10 = scmp.lt.s32.totalorder (!%p190_p9), %s537_s22, 1  ;;  %s378_s6 = sshll.u32 (!%p190_p9), %s537_s22, 3 }
   0xe   : > { %193 = sbr.rel (%p190_p9) target bundleno = 288 (0x120), region = 40  ;;  %s306_s9 = scalar_lea.hbm (!%p190_p9), %s674_s5, %s378_s6 }
   0xf   : > { %s310_s14 = sshll.u32 (!%p190_p9), %s306_s9, 4  ;;  %s442_s25 = scalar_lea.hbm (!%p190_p9), %s674_s5, 16  ;;  %s311_s14 = int_to_ptr.hbm [resolvable:$true] %s310_s14 }
  0x13   : > { %v224_v0 = vld [vmem:[%s670_s1 + $0x18] sm:$0xff]  ;;  %v223_v1 = vld [vmem:[%s670_s1 + $0x10] sm:$0xff]  ;;  %v222_v4 = vld [vmem:[%s670_s1 + $0x8] sm:$0xff]  ;;  %s217_s15 = scalar_select %p216_p10, %s537_s22, 1  ;;  %vm229_vm0 = vcmask 261120  }
  0x14   : > { %245 = vmatpush.msra.mxu0 %v224_v0  ;;  %v269_v2 = vld [vmem:[%s672_s3 + $0x78] sm:$0xff]  ;;  %v268_v3 = vld [vmem:[%s672_s3 + $0x70] sm:$0xff]  ;;  %v267_v5 = vld [vmem:[%s672_s3 + $0x68] sm:$0xff]  ;;  %s436_s22 = sshra.s32 %s311_s14, 4  ;;  %s437_s22 = int_to_ptr.hbm [resolvable:$true] %s436_s22 }
  0x15   : > { %274 = vmatpush.msra.mxu1 %v269_v2  ;;  %v221_v6 = vld [vmem:[%s670_s1] sm:$0xff]  ;;  %s375_s26 = sshll.u32 %s217_s15, 3  ;;  %v265_v9 = vld [vmem:[%s672_s3 + $0x58] sm:$0xff]  ;;  %v264_v10 = vld [vmem:[%s672_s3 + $0x50] sm:$0xff]  ;;  %s438_s16 = scalar_lea.hbm %s437_s22, 8 }
  0x16   : > { %246 = vmatpush.msra.mxu0 %v223_v1  ;;  %s219_s7 = scalar_lea.vmem %s669_s0, %s375_s26  ;;  %v266_v7 = vld [vmem:[%s672_s3 + $0x60] sm:$0xff]  ;;  %v263_v11 = vld [vmem:[%s672_s3 + $0x48] sm:$0xff]  ;;  %v261_v13 = vld [vmem:[%s672_s3 + $0x38] sm:$0xff]  ;;  %s213_s26 = sand.u32 1, %s476_s19  }
  0x17   : > { %275 = vmatpush.msra.mxu1 %v268_v3  ;;  %v220_v8 = vld [vmem:[%s219_s7] sm:$0xff]  ;;  %v260_v14 = vld [vmem:[%s672_s3 + $0x30] sm:$0xff]  ;;  %v259_v15 = vld [vmem:[%s672_s3 + $0x28] sm:$0xff]  ;;  %s374_s30 = sshll.u32 %s213_s26, 3  ;;  %s296_s15 = scalar_lea.sflag [#allocation3], %s213_s26 }
  0x18   : > { %247 = vmatpush.msra.mxu0 %v222_v4  ;;  %v262_v12 = vld [vmem:[%s672_s3 + $0x40] sm:$0xff]  ;;  %v257_v17 = vld [vmem:[%s672_s3 + $0x18] sm:$0xff]  ;;  %v256_v18 = vld [vmem:[%s672_s3 + $0x10] sm:$0xff]  ;;  %s215_s12 = scalar_lea.vmem [#allocation2], %s374_s30  ;;  %p439_p11 = scmp.ne.s32.totalorder %s437_s22, %s438_s16 }
  0x19   : > { %276 = vmatpush.msra.mxu1 %v267_v5  ;;  %v258_v16 = vld [vmem:[%s672_s3 + $0x20] sm:$0xff]  ;;  %v255_v19 = vld [vmem:[%s672_s3 + $0x8] sm:$0xff]  ;;  %s308_s13 = sshll.u32 %s215_s12, 4  ;;  %p443_p0 = scmp.lt.s32.totalorder %s437_s22, %s674_s5  ;;  %s309_s13 = int_to_ptr.vmem [resolvable:$true] %s308_s13 }
  0x1a   : > { %248 = vmatpush.msra.mxu0 %v221_v6  ;;  %v254_v20 = vld [vmem:[%s672_s3] sm:$0xff]  ;;  %p440_p12 = pnand %p439_p11, %p554_p5  ;;  %p444_p1 = scmp.lt.s32.totalorder %s442_s25, %s438_s16 }
  0x1b   : > { %376 = vmatmul.msk.f32.vlgmr.msra.gmra.mxu0 %vm229_vm0, %v220_v8  ;;  %277 = vmatpush.msra.mxu1 %v266_v7  ;;  %v420_v21 = vld [vmem:[%s671_s2] ss:$0 sm:$0xff] }
  0x1c   : > { %v421_v25 = vld [vmem:[%s673_s4] ss:$0 sm:$0xff]  ;;  %p441_p13 = pneg %p440_p12  ;;  %p445_p2 = por %p444_p1, %p443_p0 }
  0x1d   : > { %278 = vmatpush.msra.mxu1 %v265_v9 }
  0x1e   : > { %p446_p3 = pnand %p445_p2, %p441_p13 }
  0x1f   : > { %279 = vmatpush.msra.mxu1 %v264_v10 }
  0x21   : > { %280 = vmatpush.msra.mxu1 %v263_v11 }
  0x23   : > { %281 = vmatpush.msra.mxu1 %v262_v12 }
  0x25   : > { %282 = vmatpush.msra.mxu1 %v261_v13 }
  0x27   : > { %283 = vmatpush.msra.mxu1 %v260_v14 }
  0x29   : > { %284 = vmatpush.msra.mxu1 %v259_v15 }
  0x2b   : > { %285 = vmatpush.msra.mxu1 %v258_v16 }
  0x2d   : > { %286 = vmatpush.msra.mxu1 %v257_v17 }
  0x2f   : > { %287 = vmatpush.msra.mxu1 %v256_v18 }
  0x31   : > { %288 = vmatpush.msra.mxu1 %v255_v19 }
  0x33   : > { %289 = vmatpush.msra.mxu1 %v254_v20 }
  0x98   : > { %v250_v22 = vpop.f32.mrf.mxu0 }
  0x99   : > { %v251_v23 = vadd.f32 %v420_v21, %v250_v22 }
  0x9b   : > { %v253_v24 = vmax.f32 %v251_v23, 0.0 }
  0x9d   : > { %290 = vmatmul.f32.vlgmr.msra.gmra.mxu1 %v253_v24 }
 0x11a   : > { %v291_v26 = vpop.f32.mrf.mxu1 }
 0x11b   : > { %v292_v27 = vadd.f32 %v421_v25, %v291_v26 }
 0x11d   : > { %294 = vst.msk [vmem:[%s215_s12] sm:$0xff] %vm229_vm0, %v292_v27 }
 0x11e   : > { %449 = shalt.err (!%p446_p3)
}
 0x11f   : > { %381 = dma.vmem_to_hbm [thread:$0]  (%p554_p5), %s309_s13, 128, %s311_s14, %s296_s15  }
 0x120 PF: > { %p387_p4 = scmp.ge.s32.totalorder %s484_s21, 2  ;;  %s322_s26 = sand.u32 1, %s472_s18  }
 0x121   : > { %s323_s7 = scalar_lea.sflag [#allocation3], %s322_s26 }
 0x122   : > { %p384_p7 = pnand %p387_p4, %p558_p6 }
 0x124   : > { %p385_p8 = pneg %p384_p7 }
 0x126   : > { %467 = dma.done.wait (%p385_p8), %s323_s7, 128  }
 0x127   : > { %469 = vsyncadd (%p385_p8), %s323_s7, 4294967168  ;;  %p15_p9 = scmp.ge.s32.totalorder %s541_s24, 4   ;;  %s677_s18 = smov %s476_s19 }
 0x128   : > { %s678_s19 = smov %s480_s20  ;;  %s679_s20 = smov %s552_s27 }
 0x129   : > { %s680_s21 = smov %s541_s24  ;;  %17 = sbr.rel (!%p15_p9) target bundleno = 3 (0x3), region = 75 }
 0x12e   :  { %329 = vsyncpa [#allocation3], 1 }
 0x12f   :  { %331 = vsyncpa [#allocation3 + $0x1], 1 }

</bundles_post_ra>
